<compile_context>
chip_gen: v5e
topology: v5e:2x2
jax: 0.10.0
libtpu: 0.0.40
codegen_flags: <defaults>
</compile_context>

<pallas_src>
import jax
import jax.numpy as jnp
from jax.experimental import pallas as pl
from jax.experimental.pallas import tpu as pltpu

_LANE = 128
_SUBLANE = 8
_ROW_TILE_CAP = 1024       # max rows per tile on the untiled-L path
_ROW_TILE_TILED_L = 256    # rows per tile when L itself must be tiled


def _vmem_budgets():
    """(per_buffer_bytes, vmem_limit_bytes), gated on the chip generation."""
    vmem_cap = 64 * 1024 * 1024
    try:
        info = pltpu.get_tpu_info()
        vmem_cap = int(getattr(info, "vmem_capacity_bytes", vmem_cap) or vmem_cap)
    except Exception:
        pass
    if vmem_cap <= 64 * 1024 * 1024:
        # v7x-class: 64 MiB VMEM per TensorCore -> ~16 MiB live with in+out
        # double buffering, under a 32 MiB scoped limit.
        return 4 * 1024 * 1024, 32 * 1024 * 1024
    # v5e / v6e: 128 MiB physical VMEM -> bigger tiles, 64 MiB scoped limit.
    return 8 * 1024 * 1024, 64 * 1024 * 1024


def _pick_row_tile(rows, max_rows):
    """Row (sublane) tile: full extent when it fits, else a multiple of 8 that
    preferably divides `rows` evenly (avoids an under-occupied ragged tile)."""
    cap = min(rows, max_rows)
    if rows <= cap:
        return rows
    cap8 = max((cap // _SUBLANE) * _SUBLANE, _SUBLANE)
    tr = cap8
    while tr >= max(cap8 // 2, _SUBLANE):
        if rows % tr == 0:
            return tr
        tr -= _SUBLANE
    return cap8


def _pick_len_tile(l_out, max_cols):
    """L tile: a 128-multiple <= max_cols, preferring one that divides l_out
    evenly (so the only masked stores are on the final ragged row tile)."""
    cap = max((max_cols // _LANE) * _LANE, _LANE)
    k = cap // _LANE
    while k >= 1 and _LANE * k * 2 >= cap:
        cand = _LANE * k
        if l_out % cand == 0:
            return cand
        k -= 1
    return cap


def _chomp_kernel(x_ref, o_ref):
    # Pure tile copy.  On the untiled-L path the input block carries the full
    # input length and the (few) chomped tail columns are dropped here, inside
    # VMEM; on all other paths the slice is a no-op full read.
    o_ref[...] = x_ref[:, : o_ref.shape[-1]]


def chomp1d(x: jax.Array, chomp_size: int, *, per_buffer_bytes: int | None = None) -> jax.Array:
    """Pallas TPU equivalent of PyTorch Chomp1d: x[:, :, :-chomp_size].contiguous().

    x: (N, C, L). Returns (N, C, L - chomp_size), same dtype.
    `per_buffer_bytes` overrides the per-tile VMEM budget (testing knob).
    """
    assert chomp_size > 0, "chomp_size must be positive (matches x[:, :, :-k])"
    n, c, l = x.shape
    l_out = l - chomp_size
    assert l_out > 0, "chomp_size must be smaller than the sequence length"

    # Tiny sequences: lane-sparse (<128) masked stores plus pallas_call launch
    # overhead exceed the copy itself -- let XLA do (and fuse) the slice.
    if l_out < _LANE:
        return x[:, :, :l_out]

    per_buf, vmem_limit = _vmem_budgets()
    if per_buffer_bytes is not None:
        per_buf = per_buffer_bytes

    itemsize = jnp.dtype(x.dtype).itemsize
    # Flatten (N, C) into one row axis.
    rows = n * c
    x2 = x.reshape(rows, l)

    if min(rows, _SUBLANE) * l * itemsize <= per_buf:
        # Untiled L: each output row is one contiguous DMA chunk; only the
        # final row tile (if any) can be ragged.
        max_rows = max(per_buf // (l * itemsize), min(rows, _SUBLANE))
        tr = _pick_row_tile(rows, min(max_rows, _ROW_TILE_CAP))
        tl = l_out
        # Skip reading the chomped tail entirely when l_out is lane-aligned;
        # otherwise read the few extra tail columns and drop them in VMEM.
        in_l = l_out if l_out % _LANE == 0 else l
    else:
        # Very long sequences: tile L in 128-multiples as well.
        tr = _pick_row_tile(rows, _ROW_TILE_TILED_L)
        max_cols = max(per_buf // (tr * itemsize), _LANE)
        tl = _pick_len_tile(l_out, max_cols)
        in_l = tl

    grid = (pl.cdiv(rows, tr), pl.cdiv(l_out, tl))

    # Memcpy-class kernel: advisory cost = bytes actually DMA'd.
    read_cols = in_l if grid[1] == 1 else l_out
    bytes_accessed = rows * (read_cols + l_out) * itemsize

    out2 = pl.pallas_call(
        _chomp_kernel,
        out_shape=jax.ShapeDtypeStruct((rows, l_out), x.dtype),
        grid_spec=pltpu.PrefetchScalarGridSpec(
            num_scalar_prefetch=0,
            grid=grid,
            in_specs=[pl.BlockSpec((tr, in_l), lambda i, k: (i, k))],
            out_specs=pl.BlockSpec((tr, tl), lambda i, k: (i, k)),
        ),
        compiler_params=pltpu.CompilerParams(
            # Pure copy, no reductions: both axes parallel; the (large) row
            # axis leads so megacore chips shard it even when N is 1.
            dimension_semantics=("parallel", "parallel"),
            vmem_limit_bytes=vmem_limit,
        ),
        cost_estimate=pl.CostEstimate(
            flops=0, transcendentals=0, bytes_accessed=bytes_accessed),
    )(x2)
    return out2.reshape(n, c, l_out)


if __name__ == "__main__":
    key = jax.random.PRNGKey(0)
    k1, k2, k3, k4 = jax.random.split(key, 4)

    # 1) Small TCN-style demo that exercises the Pallas path
    #    (rows = N*C = 8 flattened, l_out = 253 >= 128, single lane-dense tile).
    N, C, L, chomp = 2, 4, 256, 3
    x = jax.random.normal(k1, (N, C, L), dtype=jnp.float32)
    y = jax.block_until_ready(chomp1d(x, chomp))
    assert y.shape == (N, C, L - chomp) and y.dtype == x.dtype
    assert jnp.array_equal(y, x[:, :, :-chomp])

    # 2) Tiny-sequence fallback (l_out < 128 -> plain XLA slice, no Pallas).
    x2 = jax.random.normal(k2, (2, 4, 16), dtype=jnp.float32)
    y2 = jax.block_until_ready(chomp1d(x2, 3))
    assert y2.shape == (2, 4, 13) and jnp.array_equal(y2, x2[:, :, :-3])

    # 3) Force the tiled-L path (ragged final L tile + edge-block input reads
    #    past l_out / past L) by shrinking the per-buffer budget.
    N3, C3, L3, chomp3 = 1, 20, 1500, 7
    x3 = jax.random.normal(k3, (N3, C3, L3), dtype=jnp.float32)
    y3 = jax.block_until_ready(chomp1d(x3, chomp3, per_buffer_bytes=32 * 1024))
    assert y3.shape == (N3, C3, L3 - chomp3)
    assert jnp.array_equal(y3, x3[:, :, :-chomp3])

    # 4) Ragged final row tile with a packed dtype (bf16), untiled L.
    N4, C4, L4, chomp4 = 2, 135, 640, 3
    x4 = jax.random.normal(k4, (N4, C4, L4), dtype=jnp.bfloat16)
    y4 = jax.block_until_ready(chomp1d(x4, chomp4, per_buffer_bytes=16 * 1024))
    assert y4.shape == (N4, C4, L4 - chomp4) and y4.dtype == x4.dtype
    assert jnp.array_equal(y4, x4[:, :, :-chomp4])

    print("KERNEL_OK")
</pallas_src>

<mosaic_0001>
module attributes {stable_mosaic.version = 11 : i64} {
  func.func @_chomp_kernel(%arg0: i32, %arg1: i32, %arg2: memref<8x256xf32, #tpu.memory_space<vmem>>, %arg3: memref<8x253xf32, #tpu.memory_space<vmem>>) attributes {dimension_semantics = [#tpu.dimension_semantics<parallel>, #tpu.dimension_semantics<parallel>], iteration_bounds = array<i64: 1, 1>, scalar_prefetch = 0 : i64, scratch_operands = 0 : i64, tpu.core_type = #tpu.core_type<tc>, window_params = [{transform_indices = @transform_0, window_bounds = array<i64: 8, 256>}, {transform_indices = @transform_1, window_bounds = array<i64: 8, 253>}]} {
    %c0 = arith.constant 0 : index
    %c0_0 = arith.constant 0 : index
    %0 = vector.load %arg2[%c0, %c0_0] : memref<8x256xf32, #tpu.memory_space<vmem>>, vector<8x253xf32>
    %c0_1 = arith.constant 0 : index
    %c0_2 = arith.constant 0 : index
    %1 = vector.load %arg3[%c0_1, %c0_2] : memref<8x253xf32, #tpu.memory_space<vmem>>, vector<8x253xf32>
    tpu.vector_store %arg3[%c0_1, %c0_2], %0 {strides = array<i32>} : memref<8x253xf32, #tpu.memory_space<vmem>>, vector<8x253xf32>,
    return
  }
  func.func @transform_0(%arg0: i32, %arg1: i32) -> (i32, i32) {
    %c0_i32 = arith.constant 0 : i32
    return %arg0, %arg1 : i32, i32
  }
  func.func @transform_1(%arg0: i32, %arg1: i32) -> (i32, i32) {
    %c0_i32 = arith.constant 0 : i32
    return %arg0, %arg1 : i32, i32
  }
}

</mosaic_0001>

<bundles_post_ra>
// kernel: tpu_custom_call.1
= control target key start
LH: loop header
LB: loop body
LE: loop exit
PB: predicated region body
PF: predicated region fallthrough
CT: control target
= control target key end

     0   :  { %6 = vsyncpa [#allocation3], 0  ;;  %s117_s0 = inlined_call_operand.hbm [shape: f32[8,256], index: 0, kind: input, shape index: {}]   ;;  %s118_s1 = inlined_call_operand.hbm [shape: f32[8,253], index: 1, kind: output, shape index: {}]  }
   0x1   :  { %7 = vsyncpa [#allocation4], 0  ;;  %s13_s8 = sshll.u32 %s117_s0, 4  ;;  %s99_s9 = smov [#allocation2]   ;;  %s14_s8 = int_to_ptr.hbm [resolvable:$true] %s13_s8 }
   0x2   :  { %s15_s10 = sshll.u32 %s99_s9, 4  ;;  %s16_s10 = int_to_ptr.vmem [resolvable:$true] %s15_s10 }
   0x3   :  { %18 = dma.hbm_to_vmem [thread:$0]  %s14_s8, 256, %s16_s10, [#allocation3]  }
   0x4   :  { %95 = dma.done.wait [#allocation3], 256  }
   0x5   :  { %96 = vsyncadd [#allocation3], 4294967040  ;;  %s100_s11 = smov [#allocation5]   ;;  %s35_s15 = sshll.u32 %s118_s1, 4  ;;  %vm26_vm0 = vcmask 1022976   ;;  %v23_v0 = vld [vmem:[#allocation2] sm:$0xff]  ;;  %s36_s15 = int_to_ptr.hbm [resolvable:$true] %s35_s15 }
   0x6   :  { %s33_s12 = sshll.u32 %s100_s11, 4  ;;  %v24_v1 = vld [vmem:[#allocation2 + $0x8] sm:$0xff]  ;;  %25 = vst [vmem:[#allocation5] sm:$0xff] %v23_v0  ;;  %s34_s12 = int_to_ptr.vmem [resolvable:$true] %s33_s12 }
   0x7   :  { %27 = vst.msk [vmem:[#allocation5 + $0x8] sm:$0xff] %vm26_vm0, %v24_v1 }
   0x8   :  { %38 = dma.vmem_to_hbm [thread:$0]  %s34_s12, 256, %s36_s15, [#allocation4]  }
   0x9   :  { %97 = dma.done.wait [#allocation4], 256  }
   0xa   :  { %98 = vsyncadd [#allocation4], 4294967040 }
   0xb   :  { %43 = vsyncpa [#allocation3], 1 }
   0xc   :  { %44 = vsyncpa [#allocation4], 1 }

</bundles_post_ra>
